<compile_context>
chip_gen: v6e
topology: v6e:2x2x1
jax: 0.10.0
libtpu: 0.0.40
codegen_flags: <defaults>
</compile_context>

<pallas_src>
import math
import numpy as np
import jax
import jax.numpy as jnp
from jax.experimental import pallas as pl
from jax.experimental.pallas import tpu as pltpu


def _round_up(x, m):
    return ((x + m - 1) // m) * m


# ---------------------------------------------------------------------------
# NumPy precompute (mirrors torch_geometric.nn.models.dimenet_utils)
# ---------------------------------------------------------------------------
def _sph_jn_np(x, l):
    """Spherical Bessel function j_l(x) via upward recurrence (x > 0)."""
    x = np.asarray(x, dtype=np.float64)
    j0 = np.sin(x) / x
    if l == 0:
        return j0
    j1 = np.sin(x) / x ** 2 - np.cos(x) / x
    jm2, jm1 = j0, j1
    for m in range(2, l + 1):
        jm2, jm1 = jm1, (2 * m - 1) / x * jm1 - jm2
    return jm1


def _jn_zeros(n, k):
    """First k positive zeros of j_l for l = 0..n-1 (deterministic bisection)."""
    zerosj = np.zeros((n, k), dtype=np.float64)
    zerosj[0] = np.arange(1, k + 1) * np.pi
    points = np.arange(1, k + n) * np.pi
    racines = np.zeros(k + n - 1, dtype=np.float64)
    for i in range(1, n):
        for j in range(k + n - 1 - i):
            lo, hi = float(points[j]), float(points[j + 1])
            flo = _sph_jn_np(lo, i)
            for _ in range(200):
                mid = 0.5 * (lo + hi)
                fm = _sph_jn_np(mid, i)
                if flo * fm <= 0.0:
                    hi = mid
                else:
                    lo, flo = mid, fm
            racines[j] = 0.5 * (lo + hi)
        points = racines.copy()
        zerosj[i, :k] = racines[:k]
    return zerosj


def precompute_bessel_coeffs(num_spherical, num_radial):
    """Zeros z_{l,j} and normalizers (0.5 * j_{l+1}(z)^2)^-0.5 in float64."""
    zeros = _jn_zeros(num_spherical, num_radial)              # (n, k)
    norm = np.zeros_like(zeros)
    for l in range(num_spherical):
        jn1 = _sph_jn_np(zeros[l], l + 1)                     # j_{l+1}(z_{l,j})
        norm[l] = (0.5 * jn1 ** 2) ** -0.5
    return zeros, norm


# ---------------------------------------------------------------------------
# Pass 1: per-EDGE radial basis kernel  (heavy transcendental work)
#   out[row, e] = env(d_e) * coef[row] * j_{l(row)}(z[row] * d_e)
# ---------------------------------------------------------------------------
def make_rbf_kernel(num_spherical, cutoff, p):
    """p = envelope_exponent + 1."""
    n = num_spherical
    inv_cutoff = 1.0 / float(cutoff)
    a_env = -(p + 1) * (p + 2) / 2.0
    b_env = float(p * (p + 2))
    c_env = -p * (p + 1) / 2.0

    def kernel(z_ref, invz_ref, c_ref, lsel_ref, dist_ref, out_ref):
        d = dist_ref[...] * inv_cutoff            # (1, TE)
        z = z_ref[...]                            # (NKp, 1)  Bessel zeros (1 on pad rows)
        inv_z = invz_ref[...]                     # (NKp, 1)  1/z            (1 on pad rows)
        coef = c_ref[...]                         # (NKp, 1)  norm*sqrt((2l+1)/4pi) (0 on pad)
        lsel = lsel_ref[...]                      # (NKp, 1)  float l index per row

        # --- Envelope(d) on the (1, TE) row (only narrow divide in kernel) ---
        inv_d = 1.0 / d
        d_p0 = d
        for _ in range(p - 2):                    # d^(p-1) via repeated multiply
            d_p0 = d_p0 * d
        d_p1 = d_p0 * d
        d_p2 = d_p1 * d
        env_poly = inv_d + a_env * d_p0 + b_env * d_p1 + c_env * d_p2
        env = jnp.where(d < 1.0, env_poly, 0.0)   # zeroes padded lanes (d == 1)

        # --- Full-width transcendentals over the (NKp, TE) slab ---
        x = z * d
        inv_x = inv_z * inv_d                     # no slab-wide divide: 1/(z*d) = (1/z)*(1/d)
        sx = jnp.sin(x)
        cx = jnp.cos(x)

        # --- Dense upward j_l recurrence + per-row select on l ---
        j_prev = sx * inv_x                       # j0
        acc = jnp.where(lsel == 0.0, j_prev, 0.0)
        if n > 1:
            j_cur = (j_prev - cx) * inv_x         # j1 = (sin(x)/x - cos(x)) / x
            acc = jnp.where(lsel == 1.0, j_cur, acc)
            for l in range(2, n):
                j_new = (2 * l - 1) * inv_x * j_cur - j_prev
                acc = jnp.where(lsel == float(l), j_new, acc)
                j_prev, j_cur = j_cur, j_new

        out_ref[...] = acc * env * coef           # (NKp, TE), unmasked store

    return kernel


# ---------------------------------------------------------------------------
# Pass 2: per-TRIPLET Legendre multiply kernel  (memory-bound, cheap)
#   out[row, t] = rbf_kj[row, t] * P_{l(row)}(cos(theta_t))
# ---------------------------------------------------------------------------
def make_cbf_mul_kernel(num_spherical):
    n = num_spherical

    def kernel(lsel_ref, rbf_ref, ct_ref, out_ref):
        lsel = lsel_ref[...]                      # (NKp, 1)
        rbf = rbf_ref[...]                        # (NKp, TT) gathered radial basis
        ct = ct_ref[...]                          # (1, TT)   cos(theta), hoisted to wrapper

        p_prev = jnp.ones_like(ct)                # P0
        pfac = jnp.where(lsel == 0.0, p_prev, 0.0)
        if n > 1:
            p_cur = ct                            # P1
            pfac = jnp.where(lsel == 1.0, p_cur, pfac)
            for l in range(2, n):
                p_new = ((2 * l - 1) * ct * p_cur - (l - 1) * p_prev) * (1.0 / l)
                pfac = jnp.where(lsel == float(l), p_new, pfac)
                p_prev, p_cur = p_cur, p_new

        out_ref[...] = rbf * pfac                 # (NKp, TT), unmasked store

    return kernel


# ---------------------------------------------------------------------------
# Wrapper
# ---------------------------------------------------------------------------
def spherical_basis_forward(dist, angle, idx_kj, *, num_spherical, num_radial,
                            cutoff=5.0, envelope_exponent=5,
                            tile_e=2048, tile_t=2048):
    # NOTE(v7x): pick tile_t/tile_e so the grid keeps >= 2 steps to use both
    # TensorCores; on v5e/v6e take the largest tile that fits VMEM.
    n, k = num_spherical, num_radial
    nk = n * k
    nk_pad = _round_up(nk, 8)

    zeros_np, norm_np = precompute_bessel_coeffs(n, k)        # float64 (n, k)
    sph_pref = np.array([math.sqrt((2 * l + 1) / (4.0 * math.pi)) for l in range(n)],
                        dtype=np.float64)

    # Per-basis-row constants (row r = l*k + j), padded to nk_pad rows.
    z_col = np.ones((nk_pad, 1), np.float32)                  # 1.0 on pad rows (no inf/nan)
    invz_col = np.ones((nk_pad, 1), np.float32)
    c_col = np.zeros((nk_pad, 1), np.float32)                 # 0.0 on pad rows -> output 0
    l_col = np.zeros((nk_pad, 1), np.float32)
    z_flat = zeros_np.reshape(nk)
    z_col[:nk, 0] = z_flat.astype(np.float32)
    invz_col[:nk, 0] = (1.0 / z_flat).astype(np.float32)
    c_col[:nk, 0] = (norm_np * sph_pref[:, None]).reshape(nk).astype(np.float32)
    l_col[:nk, 0] = np.repeat(np.arange(n, dtype=np.float32), k)

    z_col = jnp.asarray(z_col)
    invz_col = jnp.asarray(invz_col)
    c_col = jnp.asarray(c_col)
    l_col = jnp.asarray(l_col)

    dist = dist.astype(jnp.float32)
    angle = angle.astype(jnp.float32)
    E = dist.shape[0]
    T = angle.shape[0]

    # ---------------- Pass 1: radial basis over distinct EDGES ----------------
    te = min(tile_e, _round_up(E, 128))
    E_pad = _round_up(E, te)
    # Pad with the cutoff so the envelope zeroes padded lanes for free.
    d_row = jnp.pad(dist, (0, E_pad - E), constant_values=float(cutoff)).reshape(1, E_pad)

    rbf_kernel = make_rbf_kernel(n, float(cutoff), envelope_exponent + 1)
    rbf_t = pl.pallas_call(
        rbf_kernel,
        out_shape=jax.ShapeDtypeStruct((nk_pad, E_pad), jnp.float32),
        grid=(E_pad // te,),
        in_specs=[pl.BlockSpec((nk_pad, 1), lambda i: (0, 0)),
                  pl.BlockSpec((nk_pad, 1), lambda i: (0, 0)),
                  pl.BlockSpec((nk_pad, 1), lambda i: (0, 0)),
                  pl.BlockSpec((nk_pad, 1), lambda i: (0, 0)),
                  pl.BlockSpec((1, te), lambda i: (0, i))],
        out_specs=pl.BlockSpec((nk_pad, te), lambda i: (0, i)),
        compiler_params=pltpu.CompilerParams(
            dimension_semantics=("parallel",),
            vmem_limit_bytes=64 * 1024 * 1024),
    )(z_col, invz_col, c_col, l_col, d_row)

    # ------------- Gather per triplet (XLA), then Pass 2 multiply -------------
    tt = min(tile_t, _round_up(T, 128))
    T_pad = _round_up(T, tt)
    idx_pad = jnp.pad(idx_kj.astype(jnp.int32), (0, T_pad - T))
    rbf_kj = jnp.take(rbf_t, idx_pad, axis=1)                 # (nk_pad, T_pad)
    # cos(theta) hoisted out of the kernel; pad with 1.0 (P_l(1) finite).
    ct_row = jnp.pad(jnp.cos(angle), (0, T_pad - T),
                     constant_values=1.0).reshape(1, T_pad)

    cbf_kernel = make_cbf_mul_kernel(n)
    out_t = pl.pallas_call(
        cbf_kernel,
        out_shape=jax.ShapeDtypeStruct((nk_pad, T_pad), jnp.float32),
        grid=(T_pad // tt,),
        in_specs=[pl.BlockSpec((nk_pad, 1), lambda i: (0, 0)),
                  pl.BlockSpec((nk_pad, tt), lambda i: (0, i)),
                  pl.BlockSpec((1, tt), lambda i: (0, i))],
        out_specs=pl.BlockSpec((nk_pad, tt), lambda i: (0, i)),
        compiler_params=pltpu.CompilerParams(
            dimension_semantics=("parallel",),
            vmem_limit_bytes=64 * 1024 * 1024),
    )(l_col, rbf_kj, ct_row)

    # (nk_pad, T_pad) -> (T, n*k), matching torch's .view(-1, n*k) ordering.
    # TODO(synk): in the full DimeNet, fuse this transpose into the consumer
    # lin_sbf matmul (contract the nk axis of out_t) instead of a standalone .T.
    return out_t[:nk, :T].T


# ---------------------------------------------------------------------------
# NumPy (float64) reference — same math, torch-semantics ordering
# ---------------------------------------------------------------------------
def reference_np(dist, angle, idx_kj, n, k, cutoff, envelope_exponent):
    p = envelope_exponent + 1
    a_env = -(p + 1) * (p + 2) / 2.0
    b_env = float(p * (p + 2))
    c_env = -p * (p + 1) / 2.0
    zeros, norm = precompute_bessel_coeffs(n, k)

    d = dist.astype(np.float64) / cutoff
    env = (1.0 / d + a_env * d ** (p - 1) + b_env * d ** p + c_env * d ** (p + 1))
    env = env * (d < 1.0).astype(np.float64)

    rbf = []
    for l in range(n):
        x = d[:, None] * zeros[l][None, :]
        rbf.append(norm[l][None, :] * _sph_jn_np(x, l))
    rbf = np.concatenate(rbf, axis=1) * env[:, None]

    ct = np.cos(angle.astype(np.float64))
    P = [np.ones_like(ct), ct]
    for l in range(2, n):
        P.append(((2 * l - 1) * ct * P[-1] - (l - 1) * P[-2]) / l)
    cbf = np.stack(
        [np.full_like(ct, math.sqrt(1.0 / (4 * math.pi)))]
        + [math.sqrt((2 * l + 1) / (4 * math.pi)) * P[l] for l in range(1, n)],
        axis=1,
    )
    out = (rbf[idx_kj].reshape(-1, n, k) * cbf.reshape(-1, n, 1)).reshape(-1, n * k)
    return out.astype(np.float32)


# ---------------------------------------------------------------------------
# TODO(synk): the rest of DimeNet (radius_graph / triplet construction, scatter
# aggregation, Embedding/Interaction/Output Linear stacks) is graph glue and
# dense matmuls best left to XLA; only SphericalBasisLayer is a Pallas kernel.
if __name__ == "__main__":
    num_spherical = 3
    num_radial = 4
    cutoff = 5.0
    envelope_exponent = 5

    E = 16   # number of edges
    T = 40   # number of triplets

    key = jax.random.PRNGKey(0)
    k1, k2, k3 = jax.random.split(key, 3)
    dist = jax.random.uniform(k1, (E,), minval=0.5, maxval=4.5, dtype=jnp.float32)
    angle = jax.random.uniform(k2, (T,), minval=0.0, maxval=math.pi, dtype=jnp.float32)
    idx_kj = jax.random.randint(k3, (T,), 0, E, dtype=jnp.int32)

    out = spherical_basis_forward(
        dist, angle, idx_kj,
        num_spherical=num_spherical, num_radial=num_radial,
        cutoff=cutoff, envelope_exponent=envelope_exponent)
    out = jax.block_until_ready(out)

    ref = reference_np(np.asarray(dist), np.asarray(angle), np.asarray(idx_kj),
                       num_spherical, num_radial, cutoff, envelope_exponent)

    assert out.shape == (T, num_spherical * num_radial), out.shape
    assert np.all(np.isfinite(np.asarray(out)))
    assert np.allclose(np.asarray(out), ref, rtol=1e-3, atol=1e-3)
    print("KERNEL_OK")
</pallas_src>

<mosaic_0001>
module attributes {stable_mosaic.version = 11 : i64} {
  func.func @kernel(%arg0: i32, %arg1: memref<16x1xf32, #tpu.memory_space<vmem>>, %arg2: memref<16x1xf32, #tpu.memory_space<vmem>>, %arg3: memref<16x1xf32, #tpu.memory_space<vmem>>, %arg4: memref<16x1xf32, #tpu.memory_space<vmem>>, %arg5: memref<1x128xf32, #tpu.memory_space<vmem>>, %arg6: memref<16x128xf32, #tpu.memory_space<vmem>>) attributes {dimension_semantics = [#tpu.dimension_semantics<parallel>], iteration_bounds = array<i64: 1>, scalar_prefetch = 0 : i64, scratch_operands = 0 : i64, tpu.core_type = #tpu.core_type<tc>, window_params = [{pipeline_mode = #tpu.pipeline_mode<synchronous>, transform_indices = @transform_0, window_bounds = array<i64: 16, 1>}, {pipeline_mode = #tpu.pipeline_mode<synchronous>, transform_indices = @transform_1, window_bounds = array<i64: 16, 1>}, {pipeline_mode = #tpu.pipeline_mode<synchronous>, transform_indices = @transform_2, window_bounds = array<i64: 16, 1>}, {pipeline_mode = #tpu.pipeline_mode<synchronous>, transform_indices = @transform_3, window_bounds = array<i64: 16, 1>}, {transform_indices = @transform_4, window_bounds = array<i64: 1, 128>}, {transform_indices = @transform_5, window_bounds = array<i64: 16, 128>}]} {
    %c0 = arith.constant 0 : index
    %c0_0 = arith.constant 0 : index
    %0 = vector.load %arg5[%c0, %c0_0] : memref<1x128xf32, #tpu.memory_space<vmem>>, vector<1x128xf32>
    %cst = arith.constant 2.000000e-01 : f32
    %1 = vector.broadcast %cst : f32 to vector<1x128xf32>
    %2 = arith.mulf %0, %1 : vector<1x128xf32>
    %c0_1 = arith.constant 0 : index
    %c0_2 = arith.constant 0 : index
    %3 = vector.load %arg1[%c0_1, %c0_2] : memref<16x1xf32, #tpu.memory_space<vmem>>, vector<16x1xf32>
    %c0_3 = arith.constant 0 : index
    %c0_4 = arith.constant 0 : index
    %4 = vector.load %arg2[%c0_3, %c0_4] : memref<16x1xf32, #tpu.memory_space<vmem>>, vector<16x1xf32>
    %c0_5 = arith.constant 0 : index
    %c0_6 = arith.constant 0 : index
    %5 = vector.load %arg3[%c0_5, %c0_6] : memref<16x1xf32, #tpu.memory_space<vmem>>, vector<16x1xf32>
    %c0_7 = arith.constant 0 : index
    %c0_8 = arith.constant 0 : index
    %6 = vector.load %arg4[%c0_7, %c0_8] : memref<16x1xf32, #tpu.memory_space<vmem>>, vector<16x1xf32>
    %cst_9 = arith.constant 1.000000e+00 : f32
    %7 = vector.broadcast %cst_9 : f32 to vector<1x128xf32>
    %8 = arith.divf %7, %2 : vector<1x128xf32>
    %9 = arith.mulf %2, %2 : vector<1x128xf32>
    %10 = arith.mulf %9, %2 : vector<1x128xf32>
    %11 = arith.mulf %10, %2 : vector<1x128xf32>
    %12 = arith.mulf %11, %2 : vector<1x128xf32>
    %13 = arith.mulf %12, %2 : vector<1x128xf32>
    %14 = arith.mulf %13, %2 : vector<1x128xf32>
    %cst_10 = arith.constant -2.800000e+01 : f32
    %15 = vector.broadcast %cst_10 : f32 to vector<1x128xf32>
    %16 = arith.mulf %15, %12 : vector<1x128xf32>
    %17 = arith.addf %8, %16 : vector<1x128xf32>
    %cst_11 = arith.constant 4.800000e+01 : f32
    %18 = vector.broadcast %cst_11 : f32 to vector<1x128xf32>
    %19 = arith.mulf %18, %13 : vector<1x128xf32>
    %20 = arith.addf %17, %19 : vector<1x128xf32>
    %cst_12 = arith.constant -2.100000e+01 : f32
    %21 = vector.broadcast %cst_12 : f32 to vector<1x128xf32>
    %22 = arith.mulf %21, %14 : vector<1x128xf32>
    %23 = arith.addf %20, %22 : vector<1x128xf32>
    %cst_13 = arith.constant 1.000000e+00 : f32
    %24 = vector.broadcast %cst_13 : f32 to vector<1x128xf32>
    %25 = arith.cmpf olt, %2, %24 : vector<1x128xf32>
    %cst_14 = arith.constant 0.000000e+00 : f32
    %26 = vector.broadcast %cst_14 : f32 to vector<1x128xf32>
    %27 = arith.select %25, %23, %26 : vector<1x128xi1>, vector<1x128xf32>
    %28 = vector.broadcast %3 : vector<16x1xf32> to vector<16x128xf32>
    %29 = vector.broadcast %2 : vector<1x128xf32> to vector<16x128xf32>
    %30 = arith.mulf %28, %29 : vector<16x128xf32>
    %31 = vector.broadcast %4 : vector<16x1xf32> to vector<16x128xf32>
    %32 = vector.broadcast %8 : vector<1x128xf32> to vector<16x128xf32>
    %33 = arith.mulf %31, %32 : vector<16x128xf32>
    %34 = math.sin %30 : vector<16x128xf32>
    %35 = math.cos %30 : vector<16x128xf32>
    %36 = arith.mulf %34, %33 : vector<16x128xf32>
    %cst_15 = arith.constant 0.000000e+00 : f32
    %37 = vector.broadcast %cst_15 : f32 to vector<16x1xf32>
    %38 = arith.cmpf oeq, %6, %37 : vector<16x1xf32>
    %cst_16 = arith.constant 0.000000e+00 : f32
    %39 = vector.shape_cast %38 : vector<16x1xi1> to vector<16x1xi1>
    %40 = vector.broadcast %39 : vector<16x1xi1> to vector<16x128xi1>
    %41 = vector.broadcast %cst_16 : f32 to vector<16x128xf32>
    %42 = arith.select %40, %36, %41 : vector<16x128xi1>, vector<16x128xf32>
    %43 = arith.subf %36, %35 : vector<16x128xf32>
    %44 = arith.mulf %43, %33 : vector<16x128xf32>
    %cst_17 = arith.constant 1.000000e+00 : f32
    %45 = vector.broadcast %cst_17 : f32 to vector<16x1xf32>
    %46 = arith.cmpf oeq, %6, %45 : vector<16x1xf32>
    %47 = vector.shape_cast %46 : vector<16x1xi1> to vector<16x1xi1>
    %48 = vector.broadcast %47 : vector<16x1xi1> to vector<16x128xi1>
    %49 = arith.select %48, %44, %42 : vector<16x128xi1>, vector<16x128xf32>
    %cst_18 = arith.constant 3.000000e+00 : f32
    %50 = vector.broadcast %cst_18 : f32 to vector<16x128xf32>
    %51 = arith.mulf %50, %33 : vector<16x128xf32>
    %52 = arith.mulf %51, %44 : vector<16x128xf32>
    %53 = arith.subf %52, %36 : vector<16x128xf32>
    %cst_19 = arith.constant 2.000000e+00 : f32
    %54 = vector.broadcast %cst_19 : f32 to vector<16x1xf32>
    %55 = arith.cmpf oeq, %6, %54 : vector<16x1xf32>
    %56 = vector.shape_cast %55 : vector<16x1xi1> to vector<16x1xi1>
    %57 = vector.broadcast %56 : vector<16x1xi1> to vector<16x128xi1>
    %58 = arith.select %57, %53, %49 : vector<16x128xi1>, vector<16x128xf32>
    %59 = vector.broadcast %27 : vector<1x128xf32> to vector<16x128xf32>
    %60 = arith.mulf %58, %59 : vector<16x128xf32>
    %61 = vector.broadcast %5 : vector<16x1xf32> to vector<16x128xf32>
    %62 = arith.mulf %60, %61 : vector<16x128xf32>
    %c0_20 = arith.constant 0 : index
    %c0_21 = arith.constant 0 : index
    %63 = vector.load %arg6[%c0_20, %c0_21] : memref<16x128xf32, #tpu.memory_space<vmem>>, vector<16x128xf32>
    tpu.vector_store %arg6[%c0_20, %c0_21], %62 {strides = array<i32>} : memref<16x128xf32, #tpu.memory_space<vmem>>, vector<16x128xf32>,
    return
  }
  func.func @transform_0(%arg0: i32) -> (i32, i32) {
    %c0_i32 = arith.constant 0 : i32
    %c0_i32_0 = arith.constant 0 : i32
    %c0_i32_1 = arith.constant 0 : i32
    return %c0_i32, %c0_i32_0 : i32, i32
  }
  func.func @transform_1(%arg0: i32) -> (i32, i32) {
    %c0_i32 = arith.constant 0 : i32
    %c0_i32_0 = arith.constant 0 : i32
    %c0_i32_1 = arith.constant 0 : i32
    return %c0_i32, %c0_i32_0 : i32, i32
  }
  func.func @transform_2(%arg0: i32) -> (i32, i32) {
    %c0_i32 = arith.constant 0 : i32
    %c0_i32_0 = arith.constant 0 : i32
    %c0_i32_1 = arith.constant 0 : i32
    return %c0_i32, %c0_i32_0 : i32, i32
  }
  func.func @transform_3(%arg0: i32) -> (i32, i32) {
    %c0_i32 = arith.constant 0 : i32
    %c0_i32_0 = arith.constant 0 : i32
    %c0_i32_1 = arith.constant 0 : i32
    return %c0_i32, %c0_i32_0 : i32, i32
  }
  func.func @transform_4(%arg0: i32) -> (i32, i32) {
    %c0_i32 = arith.constant 0 : i32
    %c0_i32_0 = arith.constant 0 : i32
    return %c0_i32, %arg0 : i32, i32
  }
  func.func @transform_5(%arg0: i32) -> (i32, i32) {
    %c0_i32 = arith.constant 0 : i32
    %c0_i32_0 = arith.constant 0 : i32
    return %c0_i32, %arg0 : i32, i32
  }
}

</mosaic_0001>

<bundles_post_ra>
// kernel: tpu_custom_call.1
= control target key start
LH: loop header
LB: loop body
LE: loop exit
PB: predicated region body
PF: predicated region fallthrough
CT: control target
= control target key end

     0   :  { %v657_v1 = vmov 0   ;;  %s831_s0 = inlined_call_operand.vmem [shape: f32[16,1], index: 0, kind: input, shape index: {}]   ;;  %s832_s1 = inlined_call_operand.vmem [shape: f32[16,1], index: 1, kind: input, shape index: {}]   ;;  %s833_s2 = inlined_call_operand.vmem [shape: f32[16,1], index: 2, kind: input, shape index: {}]   ;;  %s834_s3 = inlined_call_operand.vmem [shape: f32[16,1], index: 3, kind: input, shape index: {}]   ;;  %s835_s4 = inlined_call_operand.vmem [shape: f32[1,128], index: 4, kind: input, shape index: {}]   ;;  %s836_s5 = inlined_call_operand.hbm [shape: f32[16,128], index: 5, kind: output, shape index: {}]  }
   0x1   :  { %v23_v0 = vld [vmem:[%s831_s0] sm:$0xff]  ;;  %623 = vset.pattern.permute.xlu0 %v657_v1  ;;  %624 = vset.pattern.permute.xlu1 %v657_v1  ;;  %v30_v4 = vld [vmem:[%s834_s3 + $0x8] sm:$0xff] }
   0x2   :  { %v29_v2 = vld [vmem:[%s834_s3] sm:$0xff]  ;;  %49 = vperm.xlu0 %623, %v23_v0   ;;  %v24_v5 = vld [vmem:[%s831_s0 + $0x8] sm:$0xff]  ;;  %vm500_vm1 = vcmp.eq.f32.partialorder %v30_v4, 0.0 }
   0x3   :  { %v25_v3 = vld [vmem:[%s832_s1] sm:$0xff]  ;;  %v26_v6 = vld [vmem:[%s832_s1 + $0x8] sm:$0xff]  ;;  %vm499_vm0 = vcmp.eq.f32.partialorder %v29_v2, 0.0 }
   0x4   :  { %67 = vperm.xlu1 %624, %v25_v3  }
   0x6   :  { %54 = vperm.xlu0 %623, %v24_v5  }
   0x8   :  { %72 = vperm.xlu1 %624, %v26_v6  }
   0x9   :  { %10 = vsyncpa [#allocation3], 0  ;;  %v501_v7 = vsel %vm499_vm0, 1, %v657_v1  ;;  %v502_v8 = vsel %vm500_vm1, 1, %v657_v1  ;;  %vm517_vm2 = vcmp.eq.f32.partialorder %v29_v2, 1.0  ;;  %vm518_vm3 = vcmp.eq.f32.partialorder %v30_v4, 1.0 }
   0xa   :  { %504 = vperm.xlu0 %623, %v501_v7   ;;  %v519_v9 = vsel %vm517_vm2, 1, %v657_v1  ;;  %v520_v10 = vsel %vm518_vm3, 1, %v657_v1  ;;  %vm537_vm4 = vcmp.eq.f32.partialorder %v29_v2, 2.0  ;;  %vm538_vm5 = vcmp.eq.f32.partialorder %v30_v4, 2.0  ;;  %v27_v13 = vld [vmem:[%s833_s2] sm:$0xff]  ;;  %v28_v14 = vld [vmem:[%s833_s2 + $0x8] sm:$0xff] }
   0xb   :  { %v539_v11 = vsel %vm537_vm4, 1, %v657_v1  ;;  %v540_v12 = vsel %vm538_vm5, 1, %v657_v1  ;;  %v58_v15 = vlaneseq  ;;  %v21_v17 = vld [vmem:[%s835_s4] sm:$0x1]  ;;  %v658_v41 = vmov 683565275  }
   0xc   :  { %507 = vperm.xlu1 %624, %v502_v8   ;;  %v726_v19 = vmul.f32 0.2, %v21_v17  ;;  %v659_v45 = vmov 2475754826   ;;  %v660_v47 = vmov 2131351028  }
   0xd   :  { %v59_v16 = vshrl.u32 %v58_v15, 7  ;;  %v661_v49 = vmov 2102212464   ;;  %v662_v51 = vmov 920167782   ;;  %s664_s2 = smov [#allocation2]  }
   0xe   :  { %522 = vperm.xlu0 %623, %v519_v9   ;;  %v663_v58 = vmov 1326507024   ;;  %625 = vrcp.f32 %v726_v19  ;;  %s578_s4 = sshll.u32 %s664_s2, 4  ;;  %s579_s4 = int_to_ptr.vmem [resolvable:$true] %s578_s4 }
   0xf   :  { %v724_v18 = vsub.s32 0, %v59_v16  ;;  %s635_s8 = scalar_lea.vmem %s579_s4, 256  ;;  %p640_p1 = scmp.lt.s32.totalorder %s579_s4, %s579_s4 }
  0x10   :  { %525 = vperm.xlu1 %624, %v520_v10   ;;  %p636_p0 = scmp.ne.s32.totalorder %s579_s4, %s635_s8  ;;  %p641_p2 = scmp.lt.s32.totalorder %s635_s8, %s635_s8 }
  0x11   :  { %v61_v20 = vrot.slane %v726_v19, %v724_v18 }
  0x12   :  { %542 = vperm.xlu0 %623, %v539_v11   ;;  %p642_p3 = por %p641_p2, %p640_p1 }
  0x14   :  { %545 = vperm.xlu1 %624, %v540_v12   ;;  %p643_p4 = pnand %p642_p3, %p636_p0 }
  0x16   :  { %561 = vperm.xlu0 %623, %v27_v13  }
  0x18   :  { %566 = vperm.xlu1 %624, %v28_v14  }
  0x7d   :  { %v50_v21 = vpop.permute.xlu0 %49 }
  0x7e   :  { %v730_v22 = vmul.f32 %v61_v20, %v50_v21 }
  0x80   :  { %v83_v23 = vand.u32 2147483647, %v730_v22  ;;  %v86_v24 = vand.u32 2139095040, %v730_v22  ;;  %vm85_vm4 = vcmp.lt.s32.totalorder %v730_v22, 0 }
  0x81   :  { %v55_v25 = vpop.permute.xlu0 %54 }
  0x82   :  { %v87_v26 = vshrl.u32 %v86_v24, 23  ;;  %v734_v27 = vmul.f32 %v61_v20, %v55_v25  ;;  %v90_v28 = vand.u32 8388607, %v83_v23  ;;  %vm84_vm5 = vcmp.le.f32.partialorder %v83_v23, 0.7853982 }
  0x84   :  { %v589_v29 = vadd.s32 4294967169, %v87_v26  ;;  %v190_v30 = vand.u32 2139095040, %v734_v27  ;;  %v91_v32 = vor.u32 8388608, %v90_v28  ;;  %v187_v34 = vand.u32 2147483647, %v734_v27 }
  0x86   :  { %v93_v31 = vadd.s32 1, %v589_v29  ;;  %v191_v33 = vshrl.u32 %v190_v30, 23  ;;  %v740_v39 = vshll.u32 %v91_v32, 8  ;;  %v194_v43 = vand.u32 8388607, %v187_v34 }
  0x88   :  { %vm94_vm6 = vcmp.gt.s32.totalorder %v93_v31, 0  ;;  %v593_v36 = vadd.s32 4294967169, %v191_v33  ;;  %v195_v9 = vor.u32 8388608, %v194_v43 }
  0x89   :  { %v95_v35 = vsel %vm94_vm6, %v93_v31, 0  ;;  %vm189_vm6 = vcmp.lt.s32.totalorder %v734_v27, 0 }
  0x8a   :  { %v96_v37 = vshrl.u32 %v95_v35, 5  ;;  %v97_v38 = vand.u32 31, %v95_v35  ;;  %v197_v44 = vadd.s32 1, %v593_v36  ;;  %v235_v26 = vshll.u32 %v195_v9, 8 }
  0x8c   :  { %v98_v40 = vsub.s32 32, %v97_v38  ;;  %v100_v42 = vshll.u32 %v658_v41, %v97_v38  ;;  %v103_v46 = vshll.u32 %v659_v45, %v97_v38  ;;  %v106_v48 = vshll.u32 %v660_v47, %v97_v38 }
  0x8d   :  { %v109_v50 = vshll.u32 %v661_v49, %v97_v38  ;;  %v112_v52 = vshll.u32 %v662_v51, %v97_v38  ;;  %vm115_vm7 = vcmp.lt.s32.totalorder %v96_v37, 1  ;;  %vm117_vm8 = vcmp.lt.s32.totalorder %v96_v37, 3 }
  0x8e   :  { %v101_v53 = vshrl.u32 %v659_v45, %v98_v40  ;;  %v104_v54 = vshrl.u32 %v660_v47, %v98_v40  ;;  %v107_v55 = vshrl.u32 %v661_v49, %v98_v40  ;;  %v99_v56 = vshrl.u32 %v658_v41, %v98_v40 }
  0x8f   :  { %v110_v57 = vshrl.u32 %v662_v51, %v98_v40  ;;  %v113_v59 = vshrl.u32 %v663_v58, %v98_v40  ;;  %vm198_vm9 = vcmp.gt.s32.totalorder %v197_v44, 0  ;;  %vm118_vm10 = vcmp.lt.s32.totalorder %v96_v37, 4 }
  0x90   :  { %v102_v60 = vor.u32 %v101_v53, %v100_v42  ;;  %v105_v61 = vor.u32 %v104_v54, %v103_v46  ;;  %v108_v62 = vor.u32 %v107_v55, %v106_v48  ;;  %v199_v1 = vsel %vm198_vm9, %v197_v44, 0 }
  0x91   :  { %v111_v63 = vor.u32 %v110_v57, %v109_v50  ;;  %v114_v0 = vor.u32 %v113_v59, %v112_v52  ;;  %vm116_vm11 = vcmp.lt.s32.totalorder %v96_v37, 2  ;;  %v201_v12 = vand.u32 31, %v199_v1 }
  0x92   :  { %v119_v2 = vsel %vm115_vm7, %v99_v56, %v102_v60  ;;  %v120_v3 = vsel %vm118_vm10, %v108_v62, 2102212464  ;;  %v123_v4 = vsel %vm115_vm7, %v102_v60, %v105_v61  ;;  %v127_v5 = vsel %vm115_vm7, %v105_v61, %v108_v62 }
  0x93   :  { %v121_v6 = vsel %vm117_vm8, %v105_v61, %v120_v3  ;;  %v124_v7 = vsel %vm118_vm10, %v111_v63, 920167782  ;;  %v128_v8 = vsel %vm118_vm10, %v114_v0, 1326507024  ;;  %v200_v24 = vshrl.u32 %v199_v1, 5 }
  0x94   :  { %v125_v10 = vsel %vm117_vm8, %v108_v62, %v124_v7  ;;  %v129_v11 = vsel %vm117_vm8, %v111_v63, %v128_v8  ;;  %v122_v13 = vsel %vm116_vm11, %v119_v2, %v121_v6  ;;  %v202_v25 = vsub.s32 32, %v201_v12 }
  0x95   :  { %v126_v14 = vsel %vm116_vm11, %v123_v4, %v125_v10  ;;  %v130_v15 = vsel %vm116_vm11, %v127_v5, %v129_v11  ;;  %v138_v28 = vmul.u32 %v740_v39, %v122_v13  ;;  %v204_v29 = vshll.u32 %v658_v41, %v201_v12 }
  0x96   :  { %v753_v16 = vmul.u32.u64.low %v740_v39, %v130_v15  ;;  %v754_v17 = vmul.u32.u64.high %v740_v39, %v130_v15, %v753_v16  ;;  %v757_v20 = vmul.u32.u64.low %v740_v39, %v126_v14  ;;  %v758_v21 = vmul.u32.u64.high %v740_v39, %v126_v14, %v757_v20 }
  0x97   :  { %v207_v30 = vshll.u32 %v659_v45, %v201_v12  ;;  %v210_v31 = vshll.u32 %v660_v47, %v201_v12  ;;  %v205_v32 = vshrl.u32 %v659_v45, %v202_v25  ;;  %v208_v33 = vshrl.u32 %v660_v47, %v202_v25 }
  0x98   :  { %v211_v35 = vshrl.u32 %v661_v49, %v202_v25  ;;  %v213_v36 = vshll.u32 %v661_v49, %v201_v12  ;;  %vm140_vm12 = vc.u32 %v754_v17, %v757_v20  ;;  %v141_v37 = vadd.s32 1, %v758_v21 }
  0x99   :  { %v214_v38 = vshrl.u32 %v662_v51, %v202_v25  ;;  %v216_v40 = vshll.u32 %v662_v51, %v201_v12  ;;  %v206_v42 = vor.u32 %v205_v32, %v204_v29  ;;  %v209_v43 = vor.u32 %v208_v33, %v207_v30 }
  0x9a   :  { %v212_v44 = vor.u32 %v211_v35, %v210_v31  ;;  %v217_v46 = vshrl.u32 %v663_v58, %v202_v25  ;;  %v142_v39 = vsel %vm140_vm12, %v141_v37, %v758_v21  ;;  %vm219_vm13 = vcmp.lt.s32.totalorder %v200_v24, 1 }
  0x9b   :  { %v215_v48 = vor.u32 %v214_v38, %v213_v36  ;;  %vm222_vm14 = vcmp.lt.s32.totalorder %v200_v24, 4  ;;  %v143_v45 = vadd.s32 %v142_v39, %v138_v28  ;;  %vm221_vm15 = vcmp.lt.s32.totalorder %v200_v24, 3 }
  0x9c   :  { %v218_v47 = vor.u32 %v217_v46, %v216_v40  ;;  %v224_v49 = vsel %vm222_vm14, %v212_v44, 2102212464  ;;  %v203_v50 = vshrl.u32 %v658_v41, %v202_v25  ;;  %v227_v52 = vsel %vm219_vm13, %v206_v42, %v209_v43 }
  0x9d   :  { %v228_v53 = vsel %vm222_vm14, %v215_v48, 920167782  ;;  %v231_v54 = vsel %vm219_vm13, %v209_v43, %v212_v44  ;;  %v144_v55 = vadd.s32 536870912, %v143_v45  ;;  %vm220_vm0 = vcmp.lt.s32.totalorder %v200_v24, 2 }
  0x9e   :  { %v229_v51 = vsel %vm221_vm15, %v212_v44, %v228_v53  ;;  %v232_v56 = vsel %vm222_vm14, %v218_v47, 1326507024  ;;  %v223_v57 = vsel %vm219_vm13, %v203_v50, %v206_v42  ;;  %v225_v58 = vsel %vm221_vm15, %v209_v43, %v224_v49 }
  0x9f   :  { %v230_v59 = vsel %vm220_vm0, %v227_v52, %v229_v51  ;;  %v233_v60 = vsel %vm221_vm15, %v215_v48, %v232_v56  ;;  %v768_v61 = vshrl.u32 %v144_v55, 30  ;;  %v226_v3 = vsel %vm220_vm0, %v223_v57, %v225_v58 }
  0xa0   :  { %v234_v62 = vsel %vm220_vm0, %v231_v54, %v233_v60  ;;  %v770_v63 = vmul.u32.u64.low %v235_v26, %v230_v59  ;;  %v771_v0 = vmul.u32.u64.high %v235_v26, %v230_v59, %v770_v63  ;;  %v242_v6 = vmul.u32 %v235_v26, %v226_v3 }
  0xa1   :  { %v773_v1 = vmul.u32.u64.low %v235_v26, %v234_v62  ;;  %v774_v2 = vmul.u32.u64.high %v235_v26, %v234_v62, %v773_v1  ;;  %v146_v41 = vshll.u32 %v768_v61, 30  ;;  %v139_v24 = vadd.s32 %v757_v20, %v754_v17 }
  0xa2   :  { %v245_v5 = vadd.s32 1, %v771_v0  ;;  %v33_v32 = vmul.f32 %v726_v19, %v726_v19  ;;  %v169_v49 = vsub.s32 4, %v768_v61  ;;  %vm804_vm7 = vcmp.le.f32.partialorder %v187_v34, 0.7853982  ;;  %v68_v34 = vpop.permute.xlu1 %67 }
  0xa3   :  { %v147_v4 = vsub.s32 %v143_v45, %v146_v41  ;;  %vm244_vm1 = vc.u32 %v774_v2, %v770_v63  ;;  %v243_v39 = vadd.s32 %v770_v63, %v774_v2  ;;  %v626_v2 = vpop.eup %625  ;;  %vm45_vm8 = vcmp.lt.f32.partialorder %v726_v19, 1.0 }
  0xa4   :  { %v246_v8 = vsel %vm244_vm1, %v245_v5, %v771_v0  ;;  %v34_v40 = vmul.f32 %v33_v32, %v726_v19  ;;  %v170_v58 = vsel %vm85_vm4, %v169_v49, %v768_v61  ;;  %vm175_vm15 = vweird.f32 %v730_v22 }
  0xa5   :  { %v149_v7 = vsub.s32 0, %v147_v4  ;;  %v247_v9 = vadd.s32 %v246_v8, %v242_v6  ;;  %v172_v1 = vsel %vm84_vm5, 0, %v170_v58  ;;  %vm279_vm1 = vweird.f32 %v734_v27 }
  0xa6   :  { %v35_v46 = vmul.f32 %v34_v40, %v726_v19  ;;  %v176_v6 = vadd.s32 3, %v172_v1 }
  0xa7   :  { %v590_v10 = vmin.u32 %v149_v7, %v147_v4  ;;  %v248_v11 = vadd.s32 536870912, %v247_v9 }
  0xa8   :  { %v36_v55 = vmul.f32 %v35_v46, %v726_v19 }
  0xa9   :  { %v151_v12 = vclz %v590_v10  ;;  %v780_v13 = vshrl.u32 %v248_v11, 30  ;;  %v79_v10 = vrot.slane %v626_v2, %v724_v18 }
  0xaa   :  { %v37_v60 = vmul.f32 %v36_v55, %v726_v19  ;;  %v39_v62 = vmul.f32 -28.0, %v36_v55 }
  0xab   :  { %v591_v14 = vadd.s32 4294967294, %v151_v12  ;;  %v250_v15 = vshll.u32 %v780_v13, 30  ;;  %v273_v61 = vsub.s32 4, %v780_v13 }
  0xac   :  { %v38_v41 = vmul.f32 %v37_v60, %v726_v19  ;;  %v40_v3 = vadd.f32 %v626_v2, %v39_v62 }
  0xad   :  { %vm592_vm2 = vcmp.lt.s32.totalorder %v591_v14, 0  ;;  %v251_v21 = vsub.s32 %v247_v9, %v250_v15  ;;  %v384_v15 = vand.u32 3, %v172_v1 }
  0xae   :  { %v154_v16 = vsel %vm592_vm2, 0, %v591_v14  ;;  %v43_v12 = vmul.f32 -21.0, %v38_v41  ;;  %v177_v14 = vand.u32 3, %v176_v6 }
  0xaf   :  { %v155_v25 = vsub.s32 32, %v154_v16  ;;  %v159_v26 = vsub.s32 4294967266, %v154_v16  ;;  %v253_v28 = vsub.s32 0, %v251_v21  ;;  %v156_v29 = vshll.u32 %v147_v4, %v154_v16 }
  0xb0   :  { %v41_v4 = vmul.f32 48.0, %v37_v60  ;;  %v274_v16 = vsel %vm189_vm6, %v273_v61, %v780_v13  ;;  %vm182_vm9 = vcmp.eq.s32.totalorder %v177_v14, 2  ;;  %vm389_vm10 = vcmp.eq.s32.totalorder %v384_v15, 2 }
  0xb1   :  { %v157_v30 = vshrl.u32 %v139_v24, %v155_v25  ;;  %v160_v31 = vadd.s32 127, %v159_v26  ;;  %v594_v33 = vmin.u32 %v253_v28, %v251_v21  ;;  %v505_v25 = vpop.permute.xlu0 %504  ;;  %v81_v26 = vmul.f32 %v79_v10, %v68_v34 }
  0xb2   :  { %v42_v11 = vadd.f32 %v41_v4, %v40_v3  ;;  %vm179_vm11 = vcmp.eq.s32.totalorder %v177_v14, 0  ;;  %vm386_vm12 = vcmp.eq.s32.totalorder %v384_v15, 0  ;;  %vm178_vm13 = vcmp.lt.s32.totalorder %v177_v14, 2 }
  0xb3   :  { %v158_v35 = vor.u32 %v157_v30, %v156_v29  ;;  %v161_v36 = vshll.u32 %v160_v31, 23  ;;  %v255_v37 = vclz %v594_v33  ;;  %v276_v31 = vsel %vm804_vm7, 0, %v274_v16 }
  0xb4   :  { %v44_v29 = vadd.f32 %v43_v12, %v42_v11  ;;  %vm385_vm14 = vcmp.lt.s32.totalorder %v384_v15, 2  ;;  %v487_v46 = vand.u32 3, %v276_v31  ;;  %vm509_vm0 = vcmp.eq.s32.totalorder %v505_v25, 1 }
  0xb5   :  { %v162_v38 = vor.u32 4788187, %v161_v36  ;;  %v595_v42 = vadd.s32 4294967294, %v255_v37  ;;  %v165_v44 = vcvt.s32.f32 %v158_v35 }
  0xb7   :  { %v163_v43 = vand.u32 2147483647, %v162_v38  ;;  %vm596_vm3 = vcmp.lt.s32.totalorder %v595_v42, 0  ;;  %v280_v38 = vadd.s32 3, %v276_v31 }
  0xb8   :  { %v258_v20 = vsel %vm596_vm3, 0, %v595_v42  ;;  %v73_v42 = vpop.permute.xlu1 %72  ;;  %vm488_vm3 = vcmp.lt.s32.totalorder %v487_v46, 2 }
  0xb9   :  { %v166_v17 = vmul.f32 %v165_v44, %v163_v43  ;;  %v259_v48 = vsub.s32 32, %v258_v20  ;;  %v263_v45 = vsub.s32 4294967266, %v258_v20  ;;  %v260_v50 = vshll.u32 %v251_v21, %v258_v20  ;;  %v523_v43 = vpop.permute.xlu0 %522 }
  0xba   :  { %vm527_vm2 = vcmp.eq.s32.totalorder %v523_v43, 1 }
  0xbb   :  { %v167_v47 = vxor.u32 2147483648, %v166_v17  ;;  %v261_v52 = vshrl.u32 %v243_v39, %v259_v48  ;;  %v264_v53 = vadd.s32 127, %v263_v45  ;;  %v281_v48 = vand.u32 3, %v280_v38 }
  0xbc   :  { %v531_v45 = vmul.f32 3.0, %v81_v26  ;;  %v508_v19 = vpop.permute.xlu1 %507 }
  0xbd   :  { %v168_v54 = vsel %vm85_vm4, %v167_v47, %v166_v17  ;;  %v262_v56 = vor.u32 %v261_v52, %v260_v50  ;;  %v265_v57 = vshll.u32 %v264_v53, 23  ;;  %v46_v17 = vsel %vm45_vm8, %v44_v29, 0.0 }
  0xbe   :  { %v171_v51 = vsel %vm84_vm5, %v730_v22, %v168_v54  ;;  %v555_v47 = vrot.slane %v46_v17, %v724_v18  ;;  %v82_v50 = vmul.f32 %v79_v10, %v73_v42  ;;  %vm489_vm4 = vcmp.eq.s32.totalorder %v487_v46, 0  ;;  %v543_v54 = vpop.permute.xlu0 %542 }
  0xbf   :  { %627 = vcosq.f32 %v171_v51  ;;  %v266_v59 = vor.u32 4788187, %v265_v57  ;;  %v269_v0 = vcvt.s32.f32 %v262_v56  ;;  %vm286_vm5 = vcmp.eq.s32.totalorder %v281_v48, 2 }
  0xc0   :  { %629 = vsinq.f32 %v171_v51  ;;  %vm283_vm8 = vcmp.eq.s32.totalorder %v281_v48, 0  ;;  %v526_v41 = vpop.permute.xlu1 %525 }
  0xc1   :  { %v267_v63 = vand.u32 2147483647, %v266_v59 }
  0xc2   :  { %v562_v4 = vpop.permute.xlu0 %561 }
  0xc3   :  { %v270_v23 = vmul.f32 %v269_v0, %v267_v63 }
  0xc4   :  { %v546_v10 = vpop.permute.xlu1 %545 }
  0xc5   :  { %v271_v5 = vxor.u32 2147483648, %v270_v23 }
  0xc7   :  { %v272_v8 = vsel %vm189_vm6, %v271_v5, %v270_v23  ;;  %vm492_vm6 = vcmp.eq.s32.totalorder %v487_v46, 2 }
  0xc8   :  { %v275_v9 = vsel %vm804_vm7, %v734_v27, %v272_v8  ;;  %vm282_vm7 = vcmp.lt.s32.totalorder %v281_v48, 2  ;;  %v532_v8 = vmul.f32 3.0, %v82_v50 }
  0xc9   :  { %631 = vcosq.f32 %v275_v9 }
  0xca   :  { %633 = vsinq.f32 %v275_v9 }
  0xcc   :  { %v628_v21 = vpop.eup %627 }
  0xcd   :  { %v630_v24 = vpop.eup %629  ;;  %v183_v28 = vxor.u32 2147483648, %v628_v21 }
  0xce   :  { %v180_v30 = vxor.u32 2147483648, %v630_v24 }
  0xcf   :  { %v184_v32 = vsel %vm182_vm9, %v183_v28, %v630_v24  ;;  %v391_v13 = vsel %vm389_vm10, %v183_v28, %v630_v24  ;;  %vm547_vm9 = vcmp.eq.s32.totalorder %v543_v54, 1  ;;  %vm510_vm10 = vcmp.eq.s32.totalorder %v508_v19, 1 }
  0xd0   :  { %v181_v33 = vsel %vm179_vm11, %v628_v21, %v180_v30  ;;  %v388_v35 = vsel %vm386_vm12, %v628_v21, %v180_v30  ;;  %vm528_vm11 = vcmp.eq.s32.totalorder %v526_v41, 1  ;;  %vm548_vm12 = vcmp.eq.s32.totalorder %v546_v10, 1  ;;  %v567_v21 = vpop.permute.xlu1 %566 }
  0xd1   :  { %v185_v36 = vsel %vm178_vm13, %v181_v33, %v184_v32  ;;  %v392_v37 = vsel %vm385_vm14, %v388_v35, %v391_v13 }
  0xd2   :  { %v186_v40 = vsel %vm175_vm15, nan, %v185_v36  ;;  %v393_v20 = vsel %vm175_vm15, nan, %v392_v37 }
  0xd3   :  { %v497_v44 = vmul.f32 %v186_v40, %v81_v26 }
  0xd5   :  { %v513_v39 = vsub.f32 %v497_v44, %v393_v20  ;;  %v511_v57 = vsel %vm509_vm0, %v497_v44, 0.0 }
  0xd6   :  { %v632_v49 = vpop.eup %631 }
  0xd7   :  { %v515_v22 = vmul.f32 %v513_v39, %v81_v26  ;;  %v634_v52 = vpop.eup %633  ;;  %v287_v53 = vxor.u32 2147483648, %v632_v49 }
  0xd8   :  { %v284_v51 = vxor.u32 2147483648, %v634_v52 }
  0xd9   :  { %v533_v55 = vmul.f32 %v531_v45, %v515_v22  ;;  %v288_v18 = vsel %vm286_vm5, %v287_v53, %v634_v52  ;;  %v494_v56 = vsel %vm492_vm6, %v287_v53, %v634_v52  ;;  %v529_v62 = vsel %vm527_vm2, %v515_v22, %v511_v57 }
  0xda   :  { %v285_v59 = vsel %vm283_vm8, %v632_v49, %v284_v51  ;;  %v491_v60 = vsel %vm489_vm4, %v632_v49, %v284_v51 }
  0xdb   :  { %v535_v58 = vsub.f32 %v533_v55, %v497_v44  ;;  %v289_v63 = vsel %vm282_vm7, %v285_v59, %v288_v18  ;;  %v495_v0 = vsel %vm488_vm3, %v491_v60, %v494_v56 }
  0xdc   :  { %v290_v1 = vsel %vm279_vm1, nan, %v289_v63  ;;  %v496_v5 = vsel %vm279_vm1, nan, %v495_v0 }
  0xdd   :  { %v549_v2 = vsel %vm547_vm9, %v535_v58, %v529_v62  ;;  %v498_v23 = vmul.f32 %v290_v1, %v82_v50 }
  0xde   :  { %v557_v3 = vmul.f32 %v555_v47, %v549_v2 }
  0xdf   :  { %v514_v6 = vsub.f32 %v498_v23, %v496_v5  ;;  %v512_v11 = vsel %vm510_vm10, %v498_v23, 0.0 }
  0xe0   :  { %v569_v61 = vmul.f32 %v562_v4, %v557_v3 }
  0xe1   :  { %v516_v7 = vmul.f32 %v514_v6, %v82_v50 }
  0xe2   :  { %571 = vst [vmem:[#allocation2] sm:$0xff] %v569_v61 }
  0xe3   :  { %v534_v9 = vmul.f32 %v532_v8, %v516_v7  ;;  %v530_v14 = vsel %vm528_vm11, %v516_v7, %v512_v11 }
  0xe5   :  { %v536_v12 = vsub.f32 %v534_v9, %v498_v23 }
  0xe7   :  { %v550_v15 = vsel %vm548_vm12, %v536_v12, %v530_v14 }
  0xe8   :  { %v558_v16 = vmul.f32 %v555_v47, %v550_v15 }
  0xea   :  { %v570_v27 = vmul.f32 %v567_v21, %v558_v16 }
  0xec   :  { %572 = vst [vmem:[#allocation2 + $0x8] sm:$0xff] %v570_v27 }
  0xed   :  { %646 = shalt.err (!%p643_p4)
}
  0xee   :  { %s665_s9 = smov 128   ;;  %s666_s10 = smov 8  }
  0xef   :  { %584 = dma.vmem_to_hbm [thread:$0]  %s579_s4, 256, %s836_s5, [#allocation3], %s665_s9, %s665_s9, %s666_s10  }
  0xf0   :  { %655 = dma.done.wait [#allocation3], 256  }
  0xf1   :  { %656 = vsyncadd [#allocation3], 4294967040 }
  0xf2   :  { %588 = vsyncpa [#allocation3], 1 }

</bundles_post_ra>
